<compile_context>
chip_gen: v5e
topology: v5e:2x2
jax: 0.10.0
libtpu: 0.0.40
codegen_flags: <defaults>
</compile_context>

<pallas_src>
import functools

import jax
import jax.numpy as jnp
from jax.experimental import pallas as pl
from jax.experimental.pallas import tpu as pltpu

_VMEM_LIMIT = 40 * 1024 * 1024    # raised scoped-VMEM limit (v5e default 16 MiB; < v7x 64 MiB)
_TILE_BUDGET = 24 * 1024 * 1024   # per-kernel tile footprint target


# ----------------------------- tiling helpers -------------------------------

def _row_tile(m):
    """Sublane/MXU-aligned row tile; prefer >=2 row blocks (v7x megacore)."""
    cands = (512, 256, 128, 64, 32, 16, 8)
    for c in cands:
        if 2 * c <= m and m % c == 0:
            return c
    for c in cands:
        if c <= m and m % c == 0:
            return c
    # TODO(synk): non-multiple-of-8 row counts fall back to a single full block.
    return m


def _plan_linear_tiles(m, n, k, x_bytes, w_bytes, o_bytes, budget=_TILE_BUDGET):
    """Pick (tm, tn, tk): widest N tile (x(i,:) streamed once per row tile) and
    longest K tile (amortize init/epilogue) that fit the VMEM budget."""
    tm = _row_tile(m)
    tn_cands = [n] + [c for c in (2048, 1536, 1024, 768, 512, 384, 256, 128)
                      if c < n and n % c == 0]
    tk_cands = [k] + [c for c in (1024, 768, 512, 384, 256, 128)
                      if c < k and k % c == 0]

    def footprint(tn, tk):
        return (2 * (tm * tk * x_bytes + tk * tn * w_bytes)   # double-buffered inputs
                + tm * tn * 4                                 # f32 accumulator
                + 2 * tm * tn * o_bytes                       # double-buffered output
                + 2 * tn * 4)                                 # bias

    for tn in tn_cands:
        for tk in tk_cands:
            if footprint(tn, tk) <= budget:
                return tm, tn, tk
    return tm, tn_cands[-1], tk_cands[-1]


def _plan_ln_tiles(m, n, k, x_bytes, w_bytes, o_bytes, budget=_TILE_BUDGET):
    """Row/K tiles for the fused matmul+residual+LayerNorm (N kept whole)."""
    tm = _row_tile(m)
    tk_cands = sorted({k} | {c for c in (1024, 768, 512, 384, 256, 128)
                             if c < k and k % c == 0}, reverse=True)

    def footprint(tk):
        return (2 * (tm * tk * x_bytes + tk * n * w_bytes)
                + tm * n * 4 + 2 * tm * n * x_bytes           # acc + residual
                + 2 * tm * n * o_bytes + 6 * n * 4)

    for tk in tk_cands:
        if footprint(tk) <= budget:
            return tm, tk
    return tm, tk_cands[-1]


# ----------------------------- Pallas kernels -------------------------------

def _linear_kernel(x_ref, w_ref, b_ref, o_ref, acc_ref, *, activation):
    k = pl.program_id(2)

    @pl.when(k == 0)
    def _():
        acc_ref[...] = jnp.zeros_like(acc_ref)

    acc_ref[...] += jnp.dot(
        x_ref[...].astype(jnp.bfloat16),
        w_ref[...].astype(jnp.bfloat16),
        preferred_element_type=jnp.float32)

    @pl.when(k == pl.num_programs(2) - 1)
    def _():
        y = acc_ref[...] + b_ref[...]
        if activation == "relu":
            y = jnp.maximum(y, 0.0)
        elif activation == "tanh":
            y = jnp.tanh(y)
        elif activation == "gelu":
            y = 0.5 * y * (1.0 + jnp.tanh(
                0.7978845608028654 * (y + 0.044715 * y * y * y)))
        o_ref[...] = y.astype(o_ref.dtype)


def linear(x, w, b, activation="none", out_dtype=jnp.bfloat16):
    """y = act(x @ w + b); tiled, pipelined, bf16 MXU / f32 accumulation."""
    M, K = x.shape
    Kw, N = w.shape
    assert K == Kw
    ob = jnp.dtype(out_dtype).itemsize
    tm, tn, tk = _plan_linear_tiles(M, N, K, x.dtype.itemsize, w.dtype.itemsize, ob)
    cost = pl.CostEstimate(
        flops=2 * M * N * K,
        transcendentals=(M * N if activation in ("gelu", "tanh") else 0),
        bytes_accessed=M * K * x.dtype.itemsize + K * N * w.dtype.itemsize
        + M * N * ob + N * 4)
    return pl.pallas_call(
        functools.partial(_linear_kernel, activation=activation),
        out_shape=jax.ShapeDtypeStruct((M, N), out_dtype),
        grid=(M // tm, N // tn, K // tk),
        in_specs=[
            pl.BlockSpec((tm, tk), lambda i, j, k: (i, k)),
            pl.BlockSpec((tk, tn), lambda i, j, k: (k, j)),
            pl.BlockSpec((1, tn), lambda i, j, k: (0, j)),
        ],
        out_specs=pl.BlockSpec((tm, tn), lambda i, j, k: (i, j)),
        scratch_shapes=[pltpu.VMEM((tm, tn), jnp.float32)],
        compiler_params=pltpu.CompilerParams(
            dimension_semantics=("parallel", "parallel", "arbitrary"),
            vmem_limit_bytes=_VMEM_LIMIT),
        cost_estimate=cost,
    )(x, w, b.reshape(1, N))


def _linear_add_ln_kernel(x_ref, w_ref, b_ref, r_ref, g_ref, bb_ref,
                          o_ref, acc_ref, *, eps):
    k = pl.program_id(1)

    @pl.when(k == 0)
    def _():
        acc_ref[...] = jnp.zeros_like(acc_ref)

    acc_ref[...] += jnp.dot(
        x_ref[...].astype(jnp.bfloat16),
        w_ref[...].astype(jnp.bfloat16),
        preferred_element_type=jnp.float32)

    @pl.when(k == pl.num_programs(1) - 1)
    def _():
        y = acc_ref[...] + b_ref[...] + r_ref[...].astype(jnp.float32)
        mean = jnp.mean(y, axis=-1, keepdims=True)
        yc = y - mean
        var = jnp.mean(yc * yc, axis=-1, keepdims=True)
        inv = jax.lax.rsqrt(var + eps)
        o_ref[...] = ((yc * inv) * g_ref[...] + bb_ref[...]).astype(o_ref.dtype)


def linear_add_layernorm(x, w, b, residual, gamma, beta,
                         eps=1e-12, out_dtype=jnp.bfloat16):
    """LayerNorm(x @ w + b + residual), LN fused into the matmul epilogue.
    Full output width N (= hidden) is one tile so LN runs in-register."""
    M, K = x.shape
    Kw, N = w.shape
    assert K == Kw and residual.shape == (M, N)
    ob = jnp.dtype(out_dtype).itemsize
    tm, tk = _plan_ln_tiles(M, N, K, x.dtype.itemsize, w.dtype.itemsize, ob)
    cost = pl.CostEstimate(
        flops=2 * M * N * K + 8 * M * N,
        transcendentals=0,
        bytes_accessed=M * K * x.dtype.itemsize + K * N * w.dtype.itemsize
        + M * N * (residual.dtype.itemsize + ob) + 3 * N * 4)
    return pl.pallas_call(
        functools.partial(_linear_add_ln_kernel, eps=eps),
        out_shape=jax.ShapeDtypeStruct((M, N), out_dtype),
        grid=(M // tm, K // tk),
        in_specs=[
            pl.BlockSpec((tm, tk), lambda i, k: (i, k)),
            pl.BlockSpec((tk, N), lambda i, k: (k, 0)),
            pl.BlockSpec((1, N), lambda i, k: (0, 0)),
            pl.BlockSpec((tm, N), lambda i, k: (i, 0)),
            pl.BlockSpec((1, N), lambda i, k: (0, 0)),
            pl.BlockSpec((1, N), lambda i, k: (0, 0)),
        ],
        out_specs=pl.BlockSpec((tm, N), lambda i, k: (i, 0)),
        scratch_shapes=[pltpu.VMEM((tm, N), jnp.float32)],
        compiler_params=pltpu.CompilerParams(
            dimension_semantics=("parallel", "arbitrary"),
            vmem_limit_bytes=_VMEM_LIMIT),
        cost_estimate=cost,
    )(x, w, b.reshape(1, N), residual, gamma.reshape(1, N), beta.reshape(1, N))


def _emb_ln_kernel(we_ref, te_ref, pe_ref, g_ref, b_ref, o_ref, *, eps):
    x = (we_ref[...].astype(jnp.float32) + te_ref[...].astype(jnp.float32)
         + pe_ref[...].astype(jnp.float32))
    mean = jnp.mean(x, axis=-1, keepdims=True)
    xc = x - mean
    var = jnp.mean(xc * xc, axis=-1, keepdims=True)
    inv = jax.lax.rsqrt(var + eps)
    o_ref[...] = ((xc * inv) * g_ref[...] + b_ref[...]).astype(o_ref.dtype)


def emb_layernorm(we, te, pe, gamma, beta, *, B, S, eps=1e-12,
                  out_dtype=jnp.bfloat16):
    """LayerNorm(word_emb + token_type_emb + pos_emb), add fused into the LN."""
    H = we.shape[1]
    return pl.pallas_call(
        functools.partial(_emb_ln_kernel, eps=eps),
        out_shape=jax.ShapeDtypeStruct((B * S, H), out_dtype),
        grid=(B,),
        in_specs=[
            pl.BlockSpec((S, H), lambda b: (b, 0)),
            pl.BlockSpec((S, H), lambda b: (b, 0)),
            pl.BlockSpec((S, H), lambda b: (0, 0)),
            pl.BlockSpec((1, H), lambda b: (0, 0)),
            pl.BlockSpec((1, H), lambda b: (0, 0)),
        ],
        out_specs=pl.BlockSpec((S, H), lambda b: (b, 0)),
        compiler_params=pltpu.CompilerParams(dimension_semantics=("parallel",)),
    )(we, te, pe, gamma.reshape(1, H), beta.reshape(1, H))


def _attention_kernel(qkv_ref, bias_ref, o_ref, *, n_heads, dh, hidden):
    # qkv_ref: (S, 3H) bf16 for one batch item (Q scale already folded into W_q).
    # Writes the per-head contexts side by side -> lane-dense (S, H) store,
    # no head split/merge transposes outside the kernel.
    qkv = qkv_ref[...]
    bias = bias_ref[0]                                    # (1, S) additive mask
    outs = []
    for h in range(n_heads):
        q = qkv[:, h * dh:(h + 1) * dh]                   # (S, dh)
        k = qkv[:, hidden + h * dh:hidden + (h + 1) * dh]
        v = qkv[:, 2 * hidden + h * dh:2 * hidden + (h + 1) * dh]
        s = jax.lax.dot_general(q, k, (((1,), (1,)), ((), ())),
                                preferred_element_type=jnp.float32)   # (S, S)
        s = s + bias
        m = jnp.max(s, axis=-1, keepdims=True)
        p = jnp.exp(s - m)
        denom = jnp.sum(p, axis=-1, keepdims=True)
        o = jnp.dot(p.astype(v.dtype), v, preferred_element_type=jnp.float32)
        # Deferred softmax normalization: scale the (S, dh) PV result, not the
        # (S, S) probability tile.
        o = o * pl.reciprocal(denom, approx=True)
        outs.append(o.astype(o_ref.dtype))
    o_ref[...] = jnp.concatenate(outs, axis=-1)


def attention(qkv, bias, *, B, S, n_heads, dh, out_dtype=jnp.bfloat16):
    """qkv: (B*S, 3H) fused projections; bias: (B,1,S) -> context (B*S, H)."""
    H = n_heads * dh
    cost = pl.CostEstimate(
        flops=4 * B * n_heads * S * S * dh,
        transcendentals=B * n_heads * S * S,
        bytes_accessed=qkv.size * qkv.dtype.itemsize + bias.size * 4
        + B * S * H * jnp.dtype(out_dtype).itemsize)
    return pl.pallas_call(
        functools.partial(_attention_kernel, n_heads=n_heads, dh=dh, hidden=H),
        out_shape=jax.ShapeDtypeStruct((B * S, H), out_dtype),
        grid=(B,),
        in_specs=[
            pl.BlockSpec((S, 3 * H), lambda b: (b, 0)),
            pl.BlockSpec((1, 1, S), lambda b: (b, 0, 0)),
        ],
        out_specs=pl.BlockSpec((S, H), lambda b: (b, 0)),
        compiler_params=pltpu.CompilerParams(
            dimension_semantics=("parallel",),
            vmem_limit_bytes=_VMEM_LIMIT),
        cost_estimate=cost,
    )(qkv, bias)


def _fusion_head_kernel(cls_ref, tab_ref, pool_w_ref, pool_b_ref,
                        tab1_w_ref, tab1_b_ref, tab2_w_ref, tab2_b_ref,
                        fc1a_w_ref, fc1b_w_ref, fc1_b_ref,
                        fc2_w_ref, fc2_b_ref, o_ref):
    # Pooler: tanh(Linear(cls))
    cls = cls_ref[...].astype(jnp.bfloat16)
    pooled = jnp.tanh(jnp.dot(cls, pool_w_ref[...],
                              preferred_element_type=jnp.float32) + pool_b_ref[...])
    # Tabular MLP: Linear -> ReLU -> (Dropout=id) -> Linear
    t = tab_ref[...].astype(jnp.bfloat16)
    t1 = jnp.dot(t, tab1_w_ref[...],
                 preferred_element_type=jnp.float32) + tab1_b_ref[...]
    t1 = jnp.maximum(t1, 0.0)
    t2 = jnp.dot(t1.astype(jnp.bfloat16), tab2_w_ref[...],
                 preferred_element_type=jnp.float32) + tab2_b_ref[...]
    # Fusion fc: fc1 weight pre-split so concat(pooled, tabular) is implicit.
    y = (jnp.dot(pooled.astype(jnp.bfloat16), fc1a_w_ref[...],
                 preferred_element_type=jnp.float32)
         + jnp.dot(t2.astype(jnp.bfloat16), fc1b_w_ref[...],
                   preferred_element_type=jnp.float32)
         + fc1_b_ref[...])
    y = jnp.maximum(y, 0.0)
    out = jnp.dot(y.astype(jnp.bfloat16), fc2_w_ref[...],
                  preferred_element_type=jnp.float32) + fc2_b_ref[...]
    o_ref[...] = out.astype(o_ref.dtype)


def fusion_head(cls, tab, p):
    """Pooler + tabular MLP + fusion fc, all in one kernel (weights resident)."""
    B, H = cls.shape
    Td = tab.shape[1]
    Np = p["fc2_w"].shape[1]          # lane-padded output width (>= 128)
    full = lambda shape: pl.BlockSpec(shape, lambda i: (0,) * len(shape))
    return pl.pallas_call(
        _fusion_head_kernel,
        out_shape=jax.ShapeDtypeStruct((B, Np), jnp.float32),
        grid=(1,),
        in_specs=[
            full((B, H)), full((B, Td)),
            full((H, H)), full((1, H)),
            full((Td, 256)), full((1, 256)),
            full((256, 128)), full((1, 128)),
            full((H, 128)), full((128, 128)), full((1, 128)),
            full((128, Np)), full((1, Np)),
        ],
        out_specs=full((B, Np)),
        compiler_params=pltpu.CompilerParams(dimension_semantics=("arbitrary",)),
    )(cls, tab,
      p["pool_w"], p["pool_b"].reshape(1, H),
      p["tab1_w"], p["tab1_b"].reshape(1, 256),
      p["tab2_w"], p["tab2_b"].reshape(1, 128),
      p["fc1a_w"], p["fc1b_w"], p["fc1_b"].reshape(1, 128),
      p["fc2_w"], p["fc2_b"].reshape(1, Np))


# ----------------------------- parameters -----------------------------------

def init_params(key, cfg, tabular_input_dim=77, output_numbers=13):
    H, I = cfg["hidden"], cfg["intermediate"]
    keys = iter(jax.random.split(key, 64))

    def nrm(shape, scale=0.02):
        return (scale * jax.random.normal(next(keys), shape)).astype(jnp.float32)

    zeros = lambda s: jnp.zeros(s, jnp.float32)
    ones = lambda s: jnp.ones(s, jnp.float32)

    p = dict(
        word_emb=nrm((cfg["vocab"], H)),
        pos_emb=nrm((cfg["max_pos"], H)),
        type_emb=nrm((cfg["type_vocab"], H)),
        emb_ln_g=ones((H,)), emb_ln_b=zeros((H,)),
        pool_w=nrm((H, H)), pool_b=zeros((H,)),
        tab1_w=nrm((tabular_input_dim, 256)), tab1_b=zeros((256,)),
        tab2_w=nrm((256, 128)), tab2_b=zeros((128,)),
        fc1_w=nrm((H + 128, 128)), fc1_b=zeros((128,)),
        fc2_w=nrm((128, output_numbers)), fc2_b=zeros((output_numbers,)),
        layers=[],
    )
    for _ in range(cfg["layers"]):
        p["layers"].append(dict(
            q_w=nrm((H, H)), q_b=zeros((H,)),
            k_w=nrm((H, H)), k_b=zeros((H,)),
            v_w=nrm((H, H)), v_b=zeros((H,)),
            ao_w=nrm((H, H)), ao_b=zeros((H,)),
            attn_ln_g=ones((H,)), attn_ln_b=zeros((H,)),
            i_w=nrm((H, I)), i_b=zeros((I,)),
            o_w=nrm((I, H)), o_b=zeros((H,)),
            out_ln_g=ones((H,)), out_ln_b=zeros((H,)),
        ))
    return p


def prepare_params(raw, cfg):
    """Kernel-ready params: fuse QKV (1/sqrt(dh) folded into Q), cast matmul
    weights to bf16, split fc1 (no in-kernel concat), lane-pad fc2 to 128."""
    H = cfg["hidden"]
    dh = H // cfg["heads"]
    scale = 1.0 / float(dh) ** 0.5
    bf = lambda a: a.astype(jnp.bfloat16)

    p = dict(
        word_emb=raw["word_emb"], pos_emb=raw["pos_emb"], type_emb=raw["type_emb"],
        emb_ln_g=raw["emb_ln_g"], emb_ln_b=raw["emb_ln_b"],
        pool_w=bf(raw["pool_w"]), pool_b=raw["pool_b"],
        tab1_w=bf(raw["tab1_w"]), tab1_b=raw["tab1_b"],
        tab2_w=bf(raw["tab2_w"]), tab2_b=raw["tab2_b"],
        fc1a_w=bf(raw["fc1_w"][:H]), fc1b_w=bf(raw["fc1_w"][H:]),
        fc1_b=raw["fc1_b"],
    )
    n_out = raw["fc2_w"].shape[1]
    pad = (-n_out) % 128
    p["fc2_w"] = bf(jnp.pad(raw["fc2_w"], ((0, 0), (0, pad))))
    p["fc2_b"] = jnp.pad(raw["fc2_b"], (0, pad))
    p["n_out"] = n_out

    p["layers"] = []
    for lp in raw["layers"]:
        p["layers"].append(dict(
            qkv_w=bf(jnp.concatenate(
                [lp["q_w"] * scale, lp["k_w"], lp["v_w"]], axis=1)),
            qkv_b=jnp.concatenate([lp["q_b"] * scale, lp["k_b"], lp["v_b"]]),
            ao_w=bf(lp["ao_w"]), ao_b=lp["ao_b"],
            attn_ln_g=lp["attn_ln_g"], attn_ln_b=lp["attn_ln_b"],
            i_w=bf(lp["i_w"]), i_b=lp["i_b"],
            o_w=bf(lp["o_w"]), o_b=lp["o_b"],
            out_ln_g=lp["out_ln_g"], out_ln_b=lp["out_ln_b"],
        ))
    return p


# ----------------------------- forward pass ----------------------------------

def bert_mlp_forward(params, input_ids, attention_mask, token_type_ids,
                     tabular_data, cfg):
    B, S = input_ids.shape
    H = cfg["hidden"]
    nH = cfg["heads"]
    dh = H // nH

    # --- BERT embeddings (gathers are XLA glue; add+LN is one Pallas kernel) ---
    we = params["word_emb"][input_ids].reshape(B * S, H)
    te = params["type_emb"][token_type_ids].reshape(B * S, H)
    pe = params["pos_emb"][:S]
    h = emb_layernorm(we, te, pe, params["emb_ln_g"], params["emb_ln_b"],
                      B=B, S=S)                                  # bf16 (B*S, H)

    # Additive attention-mask bias, HF-BERT convention: (1 - mask) * -10000
    bias = ((1.0 - attention_mask.astype(jnp.float32)) * -10000.0)[:, None, :]

    for lp in params["layers"]:
        # Fused QKV projection (scale pre-folded into Q weight/bias).
        qkv = linear(h, lp["qkv_w"], lp["qkv_b"], out_dtype=jnp.bfloat16)
        # Attention consumes the (B*S, 3H) slab directly and emits a lane-dense
        # (B*S, H) context -> no head split/merge transposes in XLA.
        ctx = attention(qkv, bias, B=B, S=S, n_heads=nH, dh=dh)
        # Attention output linear fused with residual-add + LayerNorm.
        h = linear_add_layernorm(ctx, lp["ao_w"], lp["ao_b"], h,
                                 lp["attn_ln_g"], lp["attn_ln_b"])
        # FFN: intermediate GELU linear, then output linear fused with add+LN.
        inter = linear(h, lp["i_w"], lp["i_b"], activation="gelu",
                       out_dtype=jnp.bfloat16)
        h = linear_add_layernorm(inter, lp["o_w"], lp["o_b"], h,
                                 lp["out_ln_g"], lp["out_ln_b"])

    # --- pooler + tabular MLP + fusion fc: one fused kernel ---
    cls = h.reshape(B, S, H)[:, 0, :]                            # tiny XLA slice
    y = fusion_head(cls, tabular_data, params)                   # (B, 128) f32
    return y[:, :params["n_out"]]


# --------------------------------- main ---------------------------------------

if __name__ == "__main__":
    # Small BERT config (same architecture, shrunk dims).
    cfg = dict(vocab=120, hidden=64, heads=2, layers=2,
               intermediate=128, max_pos=32, type_vocab=2)
    B, S = 2, 8
    TAB_DIM, N_OUT = 77, 13

    key = jax.random.PRNGKey(0)
    k_params, k_ids, k_tab = jax.random.split(key, 3)

    raw_params = init_params(k_params, cfg, tabular_input_dim=TAB_DIM,
                             output_numbers=N_OUT)
    params = prepare_params(raw_params, cfg)

    input_ids = jax.random.randint(k_ids, (B, S), 0, cfg["vocab"], dtype=jnp.int32)
    attention_mask = jnp.ones((B, S), dtype=jnp.int32).at[1, 6:].set(0)
    token_type_ids = jnp.zeros((B, S), dtype=jnp.int32)
    tabular_data = jax.random.normal(k_tab, (B, TAB_DIM), dtype=jnp.float32)

    out = bert_mlp_forward(params, input_ids, attention_mask, token_type_ids,
                           tabular_data, cfg)
    out = jax.block_until_ready(out)
    assert out.shape == (B, N_OUT) and out.dtype == jnp.float32
    print("KERNEL_OK")
</pallas_src>

<mosaic_0001>
module attributes {stable_mosaic.version = 11 : i64} {
  func.func @_emb_ln_kernel(%arg0: i32, %arg1: memref<8x64xf32, #tpu.memory_space<vmem>>, %arg2: memref<8x64xf32, #tpu.memory_space<vmem>>, %arg3: memref<8x64xf32, #tpu.memory_space<vmem>>, %arg4: memref<1x64xf32, #tpu.memory_space<vmem>>, %arg5: memref<1x64xf32, #tpu.memory_space<vmem>>, %arg6: memref<8x64xbf16, #tpu.memory_space<vmem>>) attributes {dimension_semantics = [#tpu.dimension_semantics<parallel>], iteration_bounds = array<i64: 2>, scalar_prefetch = 0 : i64, scratch_operands = 0 : i64, tpu.core_type = #tpu.core_type<tc>, window_params = [{transform_indices = @transform_0, window_bounds = array<i64: 8, 64>}, {transform_indices = @transform_1, window_bounds = array<i64: 8, 64>}, {pipeline_mode = #tpu.pipeline_mode<synchronous>, transform_indices = @transform_2, window_bounds = array<i64: 8, 64>}, {pipeline_mode = #tpu.pipeline_mode<synchronous>, transform_indices = @transform_3, window_bounds = array<i64: 1, 64>}, {pipeline_mode = #tpu.pipeline_mode<synchronous>, transform_indices = @transform_4, window_bounds = array<i64: 1, 64>}, {transform_indices = @transform_5, window_bounds = array<i64: 8, 64>}]} {
    %c0 = arith.constant 0 : index
    %c0_0 = arith.constant 0 : index
    %0 = vector.load %arg1[%c0, %c0_0] : memref<8x64xf32, #tpu.memory_space<vmem>>, vector<8x64xf32>
    %c0_1 = arith.constant 0 : index
    %c0_2 = arith.constant 0 : index
    %1 = vector.load %arg2[%c0_1, %c0_2] : memref<8x64xf32, #tpu.memory_space<vmem>>, vector<8x64xf32>
    %2 = arith.addf %0, %1 : vector<8x64xf32>
    %c0_3 = arith.constant 0 : index
    %c0_4 = arith.constant 0 : index
    %3 = vector.load %arg3[%c0_3, %c0_4] : memref<8x64xf32, #tpu.memory_space<vmem>>, vector<8x64xf32>
    %4 = arith.addf %2, %3 : vector<8x64xf32>
    %cst = arith.constant dense<0.000000e+00> : vector<8xf32>
    %5 = vector.multi_reduction <add>, %4, %cst [1] : vector<8x64xf32> to vector<8xf32>
    %6 = vector.shape_cast %5 : vector<8xf32> to vector<8x1xf32>
    %cst_5 = arith.constant 6.400000e+01 : f32
    %7 = vector.broadcast %cst_5 : f32 to vector<8x1xf32>
    %8 = arith.divf %6, %7 : vector<8x1xf32>
    %9 = vector.broadcast %8 : vector<8x1xf32> to vector<8x64xf32>
    %10 = arith.subf %4, %9 : vector<8x64xf32>
    %11 = arith.mulf %10, %10 : vector<8x64xf32>
    %cst_6 = arith.constant dense<0.000000e+00> : vector<8xf32>
    %12 = vector.multi_reduction <add>, %11, %cst_6 [1] : vector<8x64xf32> to vector<8xf32>
    %13 = vector.shape_cast %12 : vector<8xf32> to vector<8x1xf32>
    %cst_7 = arith.constant 6.400000e+01 : f32
    %14 = vector.broadcast %cst_7 : f32 to vector<8x1xf32>
    %15 = arith.divf %13, %14 : vector<8x1xf32>
    %cst_8 = arith.constant 9.99999996E-13 : f32
    %16 = vector.broadcast %cst_8 : f32 to vector<8x1xf32>
    %17 = arith.addf %15, %16 : vector<8x1xf32>
    %18 = math.rsqrt %17 : vector<8x1xf32>
    %19 = vector.broadcast %18 : vector<8x1xf32> to vector<8x64xf32>
    %20 = arith.mulf %10, %19 : vector<8x64xf32>
    %c0_9 = arith.constant 0 : index
    %c0_10 = arith.constant 0 : index
    %21 = vector.load %arg4[%c0_9, %c0_10] : memref<1x64xf32, #tpu.memory_space<vmem>>, vector<1x64xf32>
    %22 = vector.broadcast %21 : vector<1x64xf32> to vector<8x64xf32>
    %23 = arith.mulf %20, %22 : vector<8x64xf32>
    %c0_11 = arith.constant 0 : index
    %c0_12 = arith.constant 0 : index
    %24 = vector.load %arg5[%c0_11, %c0_12] : memref<1x64xf32, #tpu.memory_space<vmem>>, vector<1x64xf32>
    %25 = vector.broadcast %24 : vector<1x64xf32> to vector<8x64xf32>
    %26 = arith.addf %23, %25 : vector<8x64xf32>
    %27 = arith.truncf %26 : vector<8x64xf32> to vector<8x64xbf16>
    %c0_13 = arith.constant 0 : index
    %c0_14 = arith.constant 0 : index
    %28 = vector.load %arg6[%c0_13, %c0_14] : memref<8x64xbf16, #tpu.memory_space<vmem>>, vector<8x64xbf16>
    tpu.vector_store %arg6[%c0_13, %c0_14], %27 {strides = array<i32>} : memref<8x64xbf16, #tpu.memory_space<vmem>>, vector<8x64xbf16>,
    return
  }
  func.func @transform_0(%arg0: i32) -> (i32, i32) {
    %c0_i32 = arith.constant 0 : i32
    %c0_i32_0 = arith.constant 0 : i32
    return %arg0, %c0_i32 : i32, i32
  }
  func.func @transform_1(%arg0: i32) -> (i32, i32) {
    %c0_i32 = arith.constant 0 : i32
    %c0_i32_0 = arith.constant 0 : i32
    return %arg0, %c0_i32 : i32, i32
  }
  func.func @transform_2(%arg0: i32) -> (i32, i32) {
    %c0_i32 = arith.constant 0 : i32
    %c0_i32_0 = arith.constant 0 : i32
    %c0_i32_1 = arith.constant 0 : i32
    return %c0_i32, %c0_i32_0 : i32, i32
  }
  func.func @transform_3(%arg0: i32) -> (i32, i32) {
    %c0_i32 = arith.constant 0 : i32
    %c0_i32_0 = arith.constant 0 : i32
    %c0_i32_1 = arith.constant 0 : i32
    return %c0_i32, %c0_i32_0 : i32, i32
  }
  func.func @transform_4(%arg0: i32) -> (i32, i32) {
    %c0_i32 = arith.constant 0 : i32
    %c0_i32_0 = arith.constant 0 : i32
    %c0_i32_1 = arith.constant 0 : i32
    return %c0_i32, %c0_i32_0 : i32, i32
  }
  func.func @transform_5(%arg0: i32) -> (i32, i32) {
    %c0_i32 = arith.constant 0 : i32
    %c0_i32_0 = arith.constant 0 : i32
    return %arg0, %c0_i32 : i32, i32
  }
}

</mosaic_0001>

<bundles_post_ra>
// kernel: tpu_custom_call.1
= control target key start
LH: loop header
LB: loop body
LE: loop exit
PB: predicated region body
PF: predicated region fallthrough
CT: control target
= control target key end

     0   :  { %s917_s0 = inlined_call_operand.hbm [shape: f32[16,64], index: 0, kind: input, shape index: {}]   ;;  %s918_s1 = inlined_call_operand.hbm [shape: f32[16,64], index: 1, kind: input, shape index: {}]   ;;  %s919_s2 = inlined_call_operand.hbm [shape: f32[8,64], index: 2, kind: input, shape index: {}]   ;;  %s920_s3 = inlined_call_operand.vmem [shape: f32[1,64], index: 3, kind: input, shape index: {}]   ;;  %s921_s4 = inlined_call_operand.vmem [shape: f32[1,64], index: 4, kind: input, shape index: {}]   ;;  %s922_s5 = inlined_call_operand.hbm [shape: bf16[16,64], index: 5, kind: output, shape index: {}]  }
   0x1   :  { %926 = sst [smem:[#allocation16_spill]] %s919_s2 }
   0x2   :  { %10 = vsyncpa [#allocation3], 0 }
   0x3   :  { %12 = vsyncpa [#allocation3 + $0x1], 0 }
   0x4   :  { %13 = vsyncpa [#allocation6], 0 }
   0x5   :  { %15 = vsyncpa [#allocation6 + $0x1], 0 }
   0x6   :  { %16 = vsyncpa [#allocation4], 0 }
   0x7   :  { %18 = vsyncpa [#allocation4 + $0x1], 0  ;;  %s745_s18 = smov 0   ;;  %s747_s19 = smov 0  }
   0x8   :  { %s749_s20 = smov 0   ;;  %s751_s21 = smov 0  }
   0x9 LB: > { %927 = sst [smem:[#allocation13_spill]] %s707_s20  ;;  %s766_s22 = sadd.s32 4294967295, %s711_s21   ;;  %s711_s21 = sphi %s751_s21, %s937_s21   ;;  %s707_s20 = sphi %s749_s20, %s939_s20   ;;  %s703_s19 = sphi %s747_s19, %s941_s19   ;;  %s699_s18 = sphi %s745_s18, %s940_s18  }
   0xa   : > { %s461_s23 = sadd.s32 4294967294, %s711_s21   ;;  %p44_p0 = scmp.ne.s32.totalorder %s703_s19, %s699_s18 }
   0xb   : > { %p45_p1 = scmp.eq.s32.totalorder %s766_s22, 0  ;;  %p157_p2 = scmp.eq.s32.totalorder %s766_s22, 1 }
   0xc   : > { %p163_p3 = scmp.eq.s32.totalorder %s461_s23, 1  ;;  %p462_p5 = scmp.ge.s32.totalorder %s711_s21, 1 }
   0xd   : > { %p775_p4 = por %p45_p1, %p44_p0  ;;  %p170_p7 = scmp.lt.s32.totalorder %s711_s21, 3 }
   0xe   : > { %p780_p6 = por %p163_p3, %p44_p0  ;;  %s930_s2 = sld [smem:[#allocation16_spill]] }
   0xf   : > { %p788_p8 = pnand %p462_p5, %p170_p7  ;;  %s713_s30 = smov [#allocation7]  }
  0x10   : > { %s184_s6 = sshll.u32 %s713_s30, 4  ;;  %s798_s7 = sadd.s32 1, %s711_s21   ;;  %s185_s6 = int_to_ptr.vmem [resolvable:$true] %s184_s6 }
  0x11   : > { %p488_p10 = pneg %p788_p8  ;;  %932 = sst [smem:[#allocation14_spill]] %s798_s7 }
  0x12   : > { %s31_s8 = sadd.s32 1, %s707_s20  ;;  %s28_s9 = ssub.s32 %s711_s21, %s798_s7 }
  0x13   : > { %p489_p11 = pnand %p488_p10, %p45_p1  ;;  %p29_p12 = scmp.eq.s32.totalorder %s28_s9, 0 }
  0x14   : > { %s182_s28 = sshll.u32 %s930_s2, 4  ;;  %p38_p13 = scmp.ne.s32.totalorder %s707_s20, %s703_s19  ;;  %s183_s28 = int_to_ptr.hbm [resolvable:$true] %s182_s28 }
  0x15   : > { %491 = dma.hbm_to_vmem [thread:$0]  (!%p489_p11), %s183_s28, 128, %s185_s6, [#allocation6]  }
  0x16   : > { %p39_p0 = scmp.eq.s32.totalorder %s711_s21, 0  ;;  %p504_p3 = scmp.lt.s32.totalorder %s711_s21, 2 }
  0x17   : > { %s808_s10 = scalar_select %p29_p12, %s707_s20, %s31_s8  }
  0x18   : > { %p40_p5 = por %p39_p0, %p38_p13  ;;  %p812_p7 = por %p157_p2, %p38_p13 }
  0x19   : > { %933 = sst [smem:[#allocation15_spill]] %s808_s10  ;;  %s201_s12 = sand.u32 1, %s707_s20  }
  0x1a   : > { %s466_s13 = sshll.u32 %s711_s21, 3  ;;  %s465_s14 = sshll.u32 %s201_s12, 3 }
  0x1b   : > { %s209_s17 = scalar_lea.hbm %s917_s0, %s466_s13  ;;  %s205_s26 = scalar_lea.vmem [#allocation2], %s465_s14 }
  0x1c   : > { %s211_s23 = sshll.u32 %s209_s17, 4  ;;  %s213_s27 = sshll.u32 %s205_s26, 4  ;;  %s212_s23 = int_to_ptr.hbm [resolvable:$true] %s211_s23  ;;  %s214_s27 = int_to_ptr.vmem [resolvable:$true] %s213_s27 }
  0x1d   : > { %p823_p10 = pnand %p504_p3, %p40_p5  ;;  %s228_s8 = scalar_lea.hbm %s918_s1, %s466_s13 }
  0x1e   : > { %s220_s9 = sand.u32 1, %s711_s21   ;;  %s202_s2 = scalar_lea.sflag [#allocation3], %s201_s12 }
  0x1f   : > { %s577_s15 = sshra.s32 %s212_s23, 4  ;;  %p581_p11 = pneg %p823_p10  ;;  %s578_s15 = int_to_ptr.hbm [resolvable:$true] %s577_s15 }
  0x20   : > { %s579_s16 = scalar_lea.hbm %s578_s15, 8  ;;  %s584_s10 = scalar_lea.hbm %s917_s0, 16 }
  0x21   : > { %p580_p2 = scmp.ne.s32.totalorder %s578_s15, %s579_s16  ;;  %p585_p0 = scmp.lt.s32.totalorder %s578_s15, %s917_s0 }
  0x22   : > { %p586_p3 = scmp.lt.s32.totalorder %s584_s10, %s579_s16 }
  0x23   : > { %p582_p12 = pnand %p581_p11, %p580_p2 }
  0x24   : > { %p587_p5 = por %p586_p3, %p585_p0 }
  0x25   : > { %p583_p13 = pneg %p582_p12 }
  0x27   : > { %p588_p9 = pnand %p587_p5, %p583_p13 }
  0x29   : > { %591 = shalt.err (!%p588_p9)
}
  0x2a   : > { %495 = dma.hbm_to_vmem [thread:$0]  (!%p823_p10), %s212_s23, 128, %s214_s27, %s202_s2  }
  0x2b   : > { %s230_s12 = sshll.u32 %s228_s8, 4  ;;  %s224_s13 = scalar_lea.vmem [#allocation5], %s465_s14  ;;  %s231_s12 = int_to_ptr.hbm [resolvable:$true] %s230_s12 }
  0x2c   : > { %s232_s20 = sshll.u32 %s224_s13, 4  ;;  %s221_s7 = scalar_lea.sflag [#allocation6], %s220_s9  ;;  %s233_s20 = int_to_ptr.vmem [resolvable:$true] %s232_s20 }
  0x2d   : > { %s607_s17 = sshra.s32 %s231_s12, 4  ;;  %s614_s16 = scalar_lea.hbm %s918_s1, 16  ;;  %s608_s17 = int_to_ptr.hbm [resolvable:$true] %s607_s17 }
  0x2e   : > { %s609_s26 = scalar_lea.hbm %s608_s17, 8  ;;  %p615_p9 = scmp.lt.s32.totalorder %s608_s17, %s918_s1 }
  0x2f   : > { %p610_p2 = scmp.ne.s32.totalorder %s608_s17, %s609_s26  ;;  %p616_p13 = scmp.lt.s32.totalorder %s614_s16, %s609_s26 }
  0x31   : > { %p612_p12 = pnand %p610_p2, %p581_p11  ;;  %p617_p3 = por %p616_p13, %p615_p9 }
  0x33   : > { %p613_p0 = pneg %p612_p12 }
  0x35   : > { %p618_p5 = pnand %p617_p3, %p613_p0 }
  0x37   : > { %621 = shalt.err (!%p618_p5)
}
  0x38   : > { %498 = dma.hbm_to_vmem [thread:$0]  (!%p823_p10), %s231_s12, 128, %s233_s20, %s221_s7  }
  0x39   : > { %241 = sbr.rel (%p788_p8) target bundleno = 346 (0x15a), region = 40  ;;  %s858_s14 = sand.u32 (!%p788_p8), 1, %s703_s19  }
  0x3a   : > { %s470_s23 = sshll.u32 (!%p788_p8), %s858_s14, 3  ;;  %s244_s27 = scalar_lea.sflag (!%p788_p8), [#allocation3], %s858_s14 }
  0x3b   : > { %s247_s8 = scalar_lea.vmem (!%p788_p8), [#allocation2], %s470_s23 }
  0x3e   : > { %682 = dma.done.wait (%p775_p4), %s244_s27, 128  }
  0x3f   : > { %684 = vsyncadd (%p775_p4), %s244_s27, 4294967168  ;;  %s253_s20 = sand.u32 1, %s766_s22   ;;  %s257_s29 = scalar_lea.vmem [#allocation5], %s470_s23 }
  0x40   : > { %s254_s7 = scalar_lea.sflag [#allocation6], %s253_s20 }
  0x41   : > { %686 = dma.done.wait (%p775_p4), %s254_s7, 128  }
  0x42   : > { %688 = vsyncadd (%p775_p4), %s254_s7, 4294967168 }
  0x43   : > { %690 = dma.done.wait (%p45_p1), [#allocation6], 128  }
  0x44   : > { %692 = vsyncadd (%p45_p1), [#allocation6], 4294967168  ;;  %v295_v0 = vld [vmem:[%s247_s8] sm:$0xff]  ;;  %v296_v1 = vld [vmem:[%s257_s29] sm:$0xff]  ;;  %vm300_vm0 = vcmask 523264   ;;  %v714_v6 = vmov 64.0  }
  0x45   : > { %v298_v2 = vld [vmem:[#allocation7] sm:$0xff]  ;;  %v297_v3 = vadd.f32 %v296_v1, %v295_v0  ;;  %543 = vrcp.f32 %v714_v6  ;;  %s473_s24 = sshll.u32 %s858_s14, 2  ;;  %s475_s28 = sshll.u32 %s766_s22, 2  ;;  %vm341_vm5 = vcmask 519168  }
  0x46   : > { %v541_v27 = vld [vmem:[%s920_s3] ss:$0 sm:$0xff]  ;;  %s354_s10 = scalar_lea.hbm %s922_s5, %s475_s28  ;;  %s294_s15 = scalar_lea.vmem [#allocation8], %s473_s24 }
  0x47   : > { %v299_v4 = vadd.f32 %v298_v2, %v297_v3  ;;  %v542_v29 = vld [vmem:[%s921_s4] ss:$0 sm:$0xff]  ;;  %s356_s22 = sshll.u32 %s294_s15, 4  ;;  %s358_s16 = sshll.u32 %s354_s10, 4  ;;  %s357_s22 = int_to_ptr.vmem [resolvable:$true] %s356_s22  ;;  %s359_s16 = int_to_ptr.hbm [resolvable:$true] %s358_s16 }
  0x48   : > { %s344_s30 = scalar_lea.sflag [#allocation4], %s858_s14  ;;  %s651_s2 = sshra.s32 %s359_s16, 4  ;;  %s652_s2 = int_to_ptr.hbm [resolvable:$true] %s651_s2 }
  0x49   : > { %v301_v5 = vsel %vm300_vm0, %v299_v4, 0.0  ;;  %s653_s23 = scalar_lea.hbm %s652_s2, 4  ;;  %s657_s20 = scalar_lea.hbm %s922_s5, 8 }
  0x4a   : > { %302 = vadd.xlane.f32.xlu0 %v301_v5  ;;  %p654_p1 = scmp.ne.s32.totalorder %s652_s2, %s653_s23  ;;  %p658_p10 = scmp.lt.s32.totalorder %s652_s2, %s922_s5 }
  0x4b   : > { %v544_v7 = vpop.eup %543  ;;  %p659_p11 = scmp.lt.s32.totalorder %s657_s20, %s653_s23 }
  0x4c   : > { %v305_v8 = vmul.f32 64.0, %v544_v7  ;;  %vm309_vm1 = vweird.f32 %v544_v7  ;;  %p655_p4 = pnand %p654_p1, %p812_p7 }
  0x4d   : > { %p660_p2 = por %p659_p11, %p658_p10 }
  0x4e   : > { %v306_v9 = vsub.f32 1.0, %v305_v8  ;;  %p656_p8 = pneg %p655_p4 }
  0x50   : > { %v307_v10 = vmul.f32 %v544_v7, %v306_v9  ;;  %p661_p12 = pnand %p660_p2, %p656_p8 }
  0x52   : > { %v308_v11 = vadd.f32 %v544_v7, %v307_v10 }
  0x54   : > { %v310_v12 = vsel %vm309_vm1, %v544_v7, %v308_v11 }
  0xbd   : > { %v303_v13 = vpop.xlane.xlu0 %302 }
  0xbe   : > { %v311_v14 = vmul.f32 %v310_v12, %v303_v13 }
  0xc0   : > { %v312_v15 = vsub.f32 %v299_v4, %v311_v14 }
  0xc2   : > { %v313_v16 = vmul.f32 %v312_v15, %v312_v15 }
  0xc4   : > { %v314_v17 = vsel %vm300_vm0, %v313_v16, 0.0 }
  0xc5   : > { %315 = vadd.xlane.f32.xlu0 %v314_v17 }
 0x138   : > { %v316_v18 = vpop.xlane.xlu0 %315 }
 0x139   : > { %v317_v19 = vmul.f32 %v316_v18, %v310_v12 }
 0x13b   : > { %v318_v20 = vadd.f32 1e-12, %v317_v19 }
 0x13d   : > { %545 = vrsqrt.f32 %v318_v20  ;;  %vm325_vm3 = vweird.f32 %v318_v20 }
 0x143   : > { %v546_v21 = vpop.eup %545 }
 0x144   : > { %v320_v22 = vmul.f32 %v546_v21, %v318_v20  ;;  %vm326_vm2 = vweird.f32 %v546_v21 }
 0x145   : > { %vm327_vm4 = vmor %vm325_vm3, %vm326_vm2 }
 0x146   : > { %v321_v23 = vmul.f32 %v546_v21, %v320_v22 }
 0x148   : > { %v322_v24 = vmul.f32 0.5, %v321_v23 }
 0x14a   : > { %v323_v25 = vsub.f32 1.5, %v322_v24 }
 0x14c   : > { %v324_v26 = vmul.f32 %v546_v21, %v323_v25 }
 0x14e   : > { %v328_v28 = vsel %vm327_vm4, %v546_v21, %v324_v26 }
 0x14f   : > { %v329_v30 = vmul.f32 %v328_v28, %v312_v15 }
 0x151   : > { %v334_v31 = vmul.f32 %v541_v27, %v329_v30 }
 0x153   : > { %v339_v32 = vadd.f32 %v542_v29, %v334_v31 }
 0x155   : > { %v340_v33 = vpack.c.bf16 %v339_v32, %v339_v32 }
 0x157   : > { %342 = vst.msk [vmem:[%s294_s15] sm:$0xf] %vm341_vm5, %v340_v33 }
 0x158   : > { %664 = shalt.err (!%p661_p12)
}
 0x159   : > { %486 = dma.vmem_to_hbm [thread:$0]  (%p812_p7), %s357_s22, 64, %s359_s16, %s344_s30  }
 0x15a PF: > { %s370_s14 = sand.u32 1, %s699_s18   ;;  %p936_p0 = scmp.ge.s32.totalorder %s711_s21, 2 }
 0x15b   : > { %s371_s24 = scalar_lea.sflag [#allocation4], %s370_s14 }
 0x15c   : > { %p500_p9 = pnand %p936_p0, %p780_p6 }
 0x15e   : > { %p501_p13 = pneg %p500_p9 }
 0x160   : > { %694 = dma.done.wait (%p501_p13), %s371_s24, 64  }
 0x161   : > { %696 = vsyncadd (%p501_p13), %s371_s24, 4294967232  ;;  %s937_s21 = sld [smem:[#allocation14_spill]]  ;;  %s940_s18 = smov %s703_s19 }
 0x162   : > { %s938_s28 = sld [smem:[#allocation13_spill]] }
 0x163   : > { %s939_s20 = sld [smem:[#allocation15_spill]] }
 0x167   : > { %p21_p3 = scmp.ge.s32.totalorder %s937_s21, 4  }
 0x168   : > { %s941_s19 = smov %s938_s28 }
 0x169   :  { %23 = sbr.rel (!%p21_p3) target bundleno = 9 (0x9), region = 102 }
 0x16e   :  { %377 = vsyncpa [#allocation3], 1 }
 0x16f   :  { %379 = vsyncpa [#allocation3 + $0x1], 1 }
 0x170   :  { %380 = vsyncpa [#allocation6], 1 }
 0x171   :  { %382 = vsyncpa [#allocation6 + $0x1], 1 }
 0x172   :  { %383 = vsyncpa [#allocation4], 1 }
 0x173   :  { %385 = vsyncpa [#allocation4 + $0x1], 1 }

</bundles_post_ra>
